<compile_context>
chip_gen: v7x
topology: tpu7x:2x2x1
jax: 0.10.0
libtpu: 0.0.40
codegen_flags: <defaults>
</compile_context>

<pallas_src>
import functools

import jax
import jax.numpy as jnp
from jax.experimental import pallas as pl
from jax.experimental.pallas import tpu as pltpu


# ---------------------------------------------------------------------------
# Small helpers
# ---------------------------------------------------------------------------
def _round_up(a, b):
    return ((a + b - 1) // b) * b


def _vmem_capacity_bytes():
    """Per-core VMEM capacity; conservative (v7x) fallback if query fails."""
    try:
        cap = int(pltpu.get_tpu_info().vmem_capacity_bytes)
        if cap >= (16 << 20):
            return cap
    except Exception:
        pass
    return 64 << 20


def _clamp_tile(t, n128):
    """Largest power-of-two multiple of 128 that is <= min(t, n128)."""
    t = max(128, min(t, n128))
    p = 128
    while p * 2 <= t:
        p *= 2
    return p


# ---------------------------------------------------------------------------
# Kernel 1: whole-network fused forward (adj + everything resident in VMEM)
# ---------------------------------------------------------------------------
def _fused_net_kernel(*refs, n_layers):
    """refs = (adj, x, [w_l, b_l, alpha_l] * n_layers, out)."""
    adj_ref, x_ref = refs[0], refs[1]
    o_ref = refs[-1]
    adj = adj_ref[...]                      # bf16 [Np, Np], resident in VMEM
    h = x_ref[...]                          # bf16 [Np, F_in_pad]
    z = None
    for li in range(n_layers):
        w_ref = refs[2 + 3 * li]
        b_ref = refs[3 + 3 * li]
        a_ref = refs[4 + 3 * li]
        # (adj @ h) @ W ordering: aggregate once, transform once.
        ah = jnp.dot(adj, h, preferred_element_type=jnp.float32)
        z = jnp.dot(ah.astype(jnp.bfloat16), w_ref[...],
                    preferred_element_type=jnp.float32) + b_ref[...]
        z = jnp.where(z > 0.0, z, a_ref[...] * z)      # PReLU in f32
        h = z.astype(jnp.bfloat16)
        # Inter-layer dropout is train-time only (identity at inference).
    o_ref[...] = z.astype(o_ref.dtype)


def gcn_forward_fused(adj_p, x_p, layer_rows, *, vmem_cap, fused_need):
    """Single pallas_call for all layers. adj_p/x_p are already padded bf16."""
    n_pad = adj_p.shape[0]
    f_out = layer_rows[-1][0].shape[1]

    inputs = [adj_p, x_p]
    in_specs = [pl.BlockSpec(adj_p.shape, lambda i: (0, 0)),
                pl.BlockSpec(x_p.shape, lambda i: (0, 0))]
    flops = 0
    bytes_acc = adj_p.size * 2 + x_p.size * 2 + n_pad * f_out * 4
    f_in = x_p.shape[1]
    for (w, b, a) in layer_rows:
        inputs += [w, b, a]
        in_specs += [pl.BlockSpec(w.shape, lambda i: (0, 0)),
                     pl.BlockSpec(b.shape, lambda i: (0, 0)),
                     pl.BlockSpec(a.shape, lambda i: (0, 0))]
        flops += 2 * n_pad * n_pad * f_in + 2 * n_pad * w.shape[0] * w.shape[1]
        bytes_acc += w.size * 2 + b.size * 4 + a.size * 4
        f_in = w.shape[1]

    vmem_limit = int(min(vmem_cap - (4 << 20),
                         max(32 << 20, int(1.25 * fused_need))))

    return pl.pallas_call(
        functools.partial(_fused_net_kernel, n_layers=len(layer_rows)),
        out_shape=jax.ShapeDtypeStruct((n_pad, f_out), jnp.float32),
        grid_spec=pltpu.PrefetchScalarGridSpec(
            num_scalar_prefetch=0,
            grid=(1,),
            in_specs=in_specs,
            out_specs=pl.BlockSpec((n_pad, f_out), lambda i: (0, 0)),
        ),
        compiler_params=pltpu.CompilerParams(
            dimension_semantics=("arbitrary",),
            vmem_limit_bytes=vmem_limit),
        cost_estimate=pl.CostEstimate(flops=int(flops), transcendentals=0,
                                      bytes_accessed=int(bytes_acc)),
    )(*inputs)


# ---------------------------------------------------------------------------
# Kernel 2: one fused GCN layer, tiled for large graphs
#   grid = (row tiles of adj, reduction over adj columns)
#   X / W / b / alpha stay fully VMEM-resident; only adj streams per step.
# ---------------------------------------------------------------------------
def _gcn_layer_tiled_kernel(adj_ref, x_ref, w_ref, b_ref, a_ref, o_ref, acc_ref,
                            *, tile_k):
    k = pl.program_id(1)

    @pl.when(k == 0)
    def _():
        acc_ref[...] = jnp.zeros_like(acc_ref)

    # Aggregation: accumulate adj_row_tile @ X_k over the adj-column reduction.
    off = pl.multiple_of(k * tile_k, tile_k)
    acc_ref[...] += jnp.dot(adj_ref[...], x_ref[pl.ds(off, tile_k), :],
                            preferred_element_type=jnp.float32)

    @pl.when(k == pl.num_programs(1) - 1)
    def _():
        # Feature transform + bias + PReLU once per row tile.
        z = jnp.dot(acc_ref[...].astype(jnp.bfloat16), w_ref[...],
                    preferred_element_type=jnp.float32) + b_ref[...]
        z = jnp.where(z > 0.0, z, a_ref[...] * z)
        o_ref[...] = z.astype(o_ref.dtype)


def gcn_layer_tiled(adj_p, x_p, w, b_row, a_row, *, out_dtype, tile_n, tile_k,
                    vmem_cap):
    """adj_p: (n_pad, n_pad) bf16 (padded once by the caller).
    x_p: (n_pad, f_in) bf16.  w/b/a: feature-padded fused layer params."""
    n_pad = adj_p.shape[0]
    f_in = w.shape[0]
    f_out = w.shape[1]
    assert x_p.shape == (n_pad, f_in)
    assert n_pad % tile_n == 0 and n_pad % tile_k == 0
    grid = (n_pad // tile_n, n_pad // tile_k)

    out_itemsize = jnp.dtype(out_dtype).itemsize
    flops = 2 * n_pad * n_pad * f_in + 2 * n_pad * f_in * f_out
    bytes_acc = (n_pad * n_pad * 2 + n_pad * f_in * 2 + w.size * 2
                 + b_row.size * 4 + a_row.size * 4 + n_pad * f_out * out_itemsize)
    # NOTE: assumes full X (n_pad x f_in bf16) fits VMEM — true for any graph
    # whose dense adjacency is storable in HBM.
    vmem_need = (2 * tile_n * tile_k * 2                      # adj double-buffer
                 + 2 * n_pad * f_in * 2                       # resident X
                 + 2 * (w.size * 2 + b_row.size * 4 + a_row.size * 4)
                 + 2 * tile_n * f_out * out_itemsize          # output tile
                 + tile_n * f_in * 4)                         # f32 accumulator
    vmem_limit = int(min(vmem_cap - (4 << 20),
                         max(32 << 20, int(1.5 * vmem_need))))

    return pl.pallas_call(
        functools.partial(_gcn_layer_tiled_kernel, tile_k=tile_k),
        out_shape=jax.ShapeDtypeStruct((n_pad, f_out), out_dtype),
        grid_spec=pltpu.PrefetchScalarGridSpec(
            num_scalar_prefetch=0,
            grid=grid,
            in_specs=[
                pl.BlockSpec((tile_n, tile_k), lambda i, k: (i, k)),  # adj tile
                pl.BlockSpec((n_pad, f_in), lambda i, k: (0, 0)),     # X resident
                pl.BlockSpec((f_in, f_out), lambda i, k: (0, 0)),     # fused W
                pl.BlockSpec((1, f_out), lambda i, k: (0, 0)),        # fused bias
                pl.BlockSpec((1, f_out), lambda i, k: (0, 0)),        # PReLU slopes
            ],
            out_specs=pl.BlockSpec((tile_n, f_out), lambda i, k: (i, 0)),
            scratch_shapes=[pltpu.VMEM((tile_n, f_in), jnp.float32)],
        ),
        compiler_params=pltpu.CompilerParams(
            dimension_semantics=("parallel", "arbitrary"),
            vmem_limit_bytes=vmem_limit),
        cost_estimate=pl.CostEstimate(flops=int(flops), transcendentals=0,
                                      bytes_accessed=int(bytes_acc)),
    )(adj_p, x_p, w, b_row, a_row)


# ---------------------------------------------------------------------------
# Parameter handling (plain JAX glue)
# ---------------------------------------------------------------------------
def init_gcn_params(key, ft_size, hid_units, common_dim, n_layers, prelu_alpha=0.25):
    """Glorot-uniform W, zero b, PReLU slope per layer (torch nn.PReLU init)."""
    dims = [ft_size] + [hid_units] * (n_layers - 1) + [common_dim]
    params = []
    for li in range(n_layers):
        key, kw = jax.random.split(key)
        fan_in, fan_out = dims[li], dims[li + 1]
        limit = (6.0 / (fan_in + fan_out)) ** 0.5
        w = jax.random.uniform(kw, (fan_in, fan_out), jnp.float32, -limit, limit)
        b = jnp.zeros((fan_out,), jnp.float32)
        params.append((w, b, float(prelu_alpha)))
    return params


def _pad_layer(w, b_vec, a_vec):
    """Zero-pad a layer to 128-multiple feature dims (lane-dense MXU/VPU/vst)."""
    fi, fo = w.shape
    fi_p, fo_p = _round_up(fi, 128), _round_up(fo, 128)
    w_p = jnp.pad(w, ((0, fi_p - fi), (0, fo_p - fo))).astype(jnp.bfloat16)
    b_p = jnp.pad(b_vec, (0, fo_p - fo)).reshape(1, -1).astype(jnp.float32)
    a_p = jnp.pad(a_vec, (0, fo_p - fo)).reshape(1, -1).astype(jnp.float32)
    return w_p, b_p, a_p


def _to_rows(params):
    """Per-encoder params -> padded (W_bf16, b_row_f32, alpha_row_f32) per layer."""
    rows = []
    for (w, b, alpha) in params:
        a_vec = jnp.full((w.shape[1],), alpha, jnp.float32)
        rows.append(_pad_layer(w, b, a_vec))
    return rows


def fuse_encoder_params(params_s, params_p):
    """Fuse common/private encoders: layer 0 -> W_s||W_p, deeper -> block_diag.
    All feature dims zero-padded to multiples of 128."""
    fused = []
    for li, ((ws, bs, als), (wp, bp, alp)) in enumerate(zip(params_s, params_p)):
        if li == 0:
            w = jnp.concatenate([ws, wp], axis=1)            # shared input rows
        else:
            w = jnp.zeros((ws.shape[0] + wp.shape[0], ws.shape[1] + wp.shape[1]),
                          jnp.float32)
            w = w.at[:ws.shape[0], :ws.shape[1]].set(ws)
            w = w.at[ws.shape[0]:, ws.shape[1]:].set(wp)
        b = jnp.concatenate([bs, bp])
        a = jnp.concatenate([jnp.full((ws.shape[1],), als, jnp.float32),
                             jnp.full((wp.shape[1],), alp, jnp.float32)])
        fused.append(_pad_layer(w, b, a))
    return fused


# ---------------------------------------------------------------------------
# Forward dispatch
# ---------------------------------------------------------------------------
def gcn_forward(adj, x, layer_rows, out_dim, *, fuse_whole_net=None,
                tile_n=256, tile_k=512):
    """Run the (fused-encoder) GCN. Returns [n, out_dim] f32."""
    n = adj.shape[0]
    f_in_pad = layer_rows[0][0].shape[0]
    f_out_pad = layer_rows[-1][0].shape[1]

    vmem_cap = _vmem_capacity_bytes()
    n128 = _round_up(n, 128)

    param_bytes = sum(w.size * 2 + b.size * 4 + a.size * 4
                      for (w, b, a) in layer_rows)
    max_width = max(max(w.shape) for (w, _, _) in layer_rows)
    # Double-buffered residents (adj, x, params) + f32 intermediates + output.
    fused_need = (2 * (n128 * n128 * 2 + n128 * f_in_pad * 2 + param_bytes)
                  + 3 * n128 * max_width * 4 + 2 * n128 * f_out_pad * 4)
    if fuse_whole_net is None:
        fuse_whole_net = fused_need <= int(0.55 * vmem_cap)

    if fuse_whole_net:
        n_pad = n128
    else:
        tile_n = _clamp_tile(tile_n, n128)
        tile_k = _clamp_tile(tile_k, n128)
        n_pad = _round_up(n, max(tile_n, tile_k))
        # Keep >=2 row tiles so the "parallel" axis can shard across v7x's 2 TCs.
        while n_pad // tile_n < 2 and tile_n > 128:
            tile_n //= 2
            n_pad = _round_up(n, max(tile_n, tile_k))

    # One-time padding + bf16 cast (hoisted out of the per-layer loop).
    # Zero-padded adj columns contribute nothing; padded rows are sliced off.
    if n_pad != n:
        adj_p = jnp.pad(adj, ((0, n_pad - n), (0, n_pad - n)))
    else:
        adj_p = adj
    adj_p = adj_p.astype(jnp.bfloat16)
    x_p = x
    if n_pad != n or x.shape[1] != f_in_pad:
        x_p = jnp.pad(x, ((0, n_pad - n), (0, f_in_pad - x.shape[1])))
    x_p = x_p.astype(jnp.bfloat16)

    if fuse_whole_net:
        out = gcn_forward_fused(adj_p, x_p, layer_rows,
                                vmem_cap=vmem_cap, fused_need=fused_need)
    else:
        h = x_p
        for li, (w, b, a) in enumerate(layer_rows):
            is_last = li == len(layer_rows) - 1
            h = gcn_layer_tiled(adj_p, h, w, b, a,
                                out_dtype=jnp.float32 if is_last else jnp.bfloat16,
                                tile_n=tile_n, tile_k=tile_k, vmem_cap=vmem_cap)
        out = h
    return out[:n, :out_dim]


def gcn_ref(params, x, adj):
    """Pure f32 JAX reference (matches the PyTorch GCN layer math)."""
    h = x
    for (w, b, alpha) in params:
        z = adj @ (h @ w) + b
        h = jnp.where(z > 0, z, alpha * z)
    return h


# ---------------------------------------------------------------------------
# GNNEncoder port
# ---------------------------------------------------------------------------
class GNNEncoderJAX:
    """JAX/Pallas port of models/DMG.py::GNNEncoder (forward pass only)."""

    def __init__(self, ft_size, hid_units, common_dim, encolayer, seed=0):
        key = jax.random.PRNGKey(seed)
        ks, kp = jax.random.split(key)
        self.params_s = init_gcn_params(ks, ft_size, hid_units, common_dim, encolayer)
        self.params_p = init_gcn_params(kp, ft_size, hid_units, common_dim, encolayer)
        self.common_dim = common_dim
        # TODO(synk): enc_mask_token is a learnable nn.Parameter in the reference;
        # carried here with its zero init.
        self.enc_mask_token = jnp.zeros((1, ft_size), jnp.float32)
        self.fused_params = fuse_encoder_params(self.params_s, self.params_p)
        self.rows_s = _to_rows(self.params_s)
        self.rows_p = _to_rows(self.params_p)

    def random_remask(self, rep, key, remask_rate=0.5):
        # Plain-JAX glue mirroring torch.randperm-based masking.
        num_nodes = rep.shape[0]
        perm = jax.random.permutation(key, num_nodes)
        num_remask = int(remask_rate * num_nodes)
        remask_nodes = perm[:num_remask]
        return rep.at[remask_nodes].set(self.enc_mask_token[0])

    def forward(self, x, adj, mask_rate=0, key=None):
        if mask_rate == 0:
            out = gcn_forward(adj, x, self.fused_params, 2 * self.common_dim)
            common = out[:, :self.common_dim]
            private = out[:, self.common_dim:]
        else:
            k1, k2 = jax.random.split(key)
            common = gcn_forward(adj, self.random_remask(x, k1), self.rows_s,
                                 self.common_dim)
            private = gcn_forward(adj, self.random_remask(x, k2), self.rows_p,
                                  self.common_dim)
        return ([common, private], 0)


# ---------------------------------------------------------------------------
# Main
# ---------------------------------------------------------------------------
def make_adj(key, n):
    a = (jax.random.uniform(key, (n, n)) < 0.1).astype(jnp.float32)
    a = jnp.maximum(a, a.T) + jnp.eye(n, dtype=jnp.float32)
    # TODO(synk): assumes row-normalized adjacency (D^-1 A); swap to symmetric
    # D^-1/2 A D^-1/2 if models/DMG.py preprocessing uses that instead.
    return a / jnp.sum(a, axis=1, keepdims=True)


if __name__ == "__main__":
    # --- small problem (shipped shapes): whole-net fused kernel path ---
    N, FT, HID, COMMON, LAYERS = 64, 32, 32, 16, 2
    key = jax.random.PRNGKey(0)
    kx, ka, kx2, ka2 = jax.random.split(key, 4)

    x = jax.random.normal(kx, (N, FT), jnp.float32)
    adj = make_adj(ka, N)

    enc = GNNEncoderJAX(FT, HID, COMMON, LAYERS, seed=0)
    (outs, zero) = enc.forward(x, adj, mask_rate=0)
    common, private = outs
    jax.block_until_ready(common)
    jax.block_until_ready(private)

    assert common.shape == (N, COMMON) and private.shape == (N, COMMON)
    assert zero == 0
    ref_c = gcn_ref(enc.params_s, x, adj)
    ref_p = gcn_ref(enc.params_p, x, adj)
    assert jnp.allclose(common, ref_c, rtol=1e-1, atol=1e-1)
    assert jnp.allclose(private, ref_p, rtol=1e-1, atol=1e-1)

    # --- larger graph (non-divisible N): tiled row-tile x reduction path ---
    N2 = 320
    x2 = jax.random.normal(kx2, (N2, FT), jnp.float32)
    adj2 = make_adj(ka2, N2)
    out2 = gcn_forward(adj2, x2, enc.fused_params, 2 * COMMON,
                       fuse_whole_net=False)     # default big tiles, auto-clamped
    jax.block_until_ready(out2)
    assert out2.shape == (N2, 2 * COMMON)
    ref2_c = gcn_ref(enc.params_s, x2, adj2)
    ref2_p = gcn_ref(enc.params_p, x2, adj2)
    assert jnp.allclose(out2[:, :COMMON], ref2_c, rtol=1e-1, atol=1e-1)
    assert jnp.allclose(out2[:, COMMON:], ref2_p, rtol=1e-1, atol=1e-1)

    print("KERNEL_OK")
</pallas_src>

<mosaic_0001>
module attributes {stable_mosaic.version = 11 : i64} {
  func.func @_fused_net_kernel(%arg0: i32, %arg1: memref<128x128xbf16, #tpu.memory_space<vmem>>, %arg2: memref<128x128xbf16, #tpu.memory_space<vmem>>, %arg3: memref<128x128xbf16, #tpu.memory_space<vmem>>, %arg4: memref<1x128xf32, #tpu.memory_space<vmem>>, %arg5: memref<1x128xf32, #tpu.memory_space<vmem>>, %arg6: memref<128x128xbf16, #tpu.memory_space<vmem>>, %arg7: memref<1x128xf32, #tpu.memory_space<vmem>>, %arg8: memref<1x128xf32, #tpu.memory_space<vmem>>, %arg9: memref<128x128xf32, #tpu.memory_space<vmem>>) attributes {dimension_semantics = [#tpu.dimension_semantics<arbitrary>], iteration_bounds = array<i64: 1>, scalar_prefetch = 0 : i64, scratch_operands = 0 : i64, tpu.core_type = #tpu.core_type<tc>, window_params = [{pipeline_mode = #tpu.pipeline_mode<synchronous>, transform_indices = @transform_0, window_bounds = array<i64: 128, 128>}, {pipeline_mode = #tpu.pipeline_mode<synchronous>, transform_indices = @transform_1, window_bounds = array<i64: 128, 128>}, {pipeline_mode = #tpu.pipeline_mode<synchronous>, transform_indices = @transform_2, window_bounds = array<i64: 128, 128>}, {pipeline_mode = #tpu.pipeline_mode<synchronous>, transform_indices = @transform_3, window_bounds = array<i64: 1, 128>}, {pipeline_mode = #tpu.pipeline_mode<synchronous>, transform_indices = @transform_4, window_bounds = array<i64: 1, 128>}, {pipeline_mode = #tpu.pipeline_mode<synchronous>, transform_indices = @transform_5, window_bounds = array<i64: 128, 128>}, {pipeline_mode = #tpu.pipeline_mode<synchronous>, transform_indices = @transform_6, window_bounds = array<i64: 1, 128>}, {pipeline_mode = #tpu.pipeline_mode<synchronous>, transform_indices = @transform_7, window_bounds = array<i64: 1, 128>}, {pipeline_mode = #tpu.pipeline_mode<synchronous>, transform_indices = @transform_8, window_bounds = array<i64: 128, 128>}]} {
    %c0 = arith.constant 0 : index
    %c0_0 = arith.constant 0 : index
    %0 = vector.load %arg1[%c0, %c0_0] : memref<128x128xbf16, #tpu.memory_space<vmem>>, vector<128x128xbf16>
    %c0_1 = arith.constant 0 : index
    %c0_2 = arith.constant 0 : index
    %1 = vector.load %arg2[%c0_1, %c0_2] : memref<128x128xbf16, #tpu.memory_space<vmem>>, vector<128x128xbf16>
    %cst = arith.constant dense<0.000000e+00> : vector<128x128xf32>
    %2 = tpu.matmul %0, %1, %cst {dimension_numbers = #tpu.dot_dimension_numbers<[1], [0], [0], [1], [0, 0, 1, 1], [], []>} : vector<128x128xbf16>, vector<128x128xbf16>, vector<128x128xf32> -> vector<128x128xf32>
    %3 = arith.truncf %2 : vector<128x128xf32> to vector<128x128xbf16>
    %c0_3 = arith.constant 0 : index
    %c0_4 = arith.constant 0 : index
    %4 = vector.load %arg3[%c0_3, %c0_4] : memref<128x128xbf16, #tpu.memory_space<vmem>>, vector<128x128xbf16>
    %cst_5 = arith.constant dense<0.000000e+00> : vector<128x128xf32>
    %5 = tpu.matmul %3, %4, %cst_5 {dimension_numbers = #tpu.dot_dimension_numbers<[1], [0], [0], [1], [0, 0, 1, 1], [], []>} : vector<128x128xbf16>, vector<128x128xbf16>, vector<128x128xf32> -> vector<128x128xf32>
    %c0_6 = arith.constant 0 : index
    %c0_7 = arith.constant 0 : index
    %6 = vector.load %arg4[%c0_6, %c0_7] : memref<1x128xf32, #tpu.memory_space<vmem>>, vector<1x128xf32>
    %7 = vector.broadcast %6 : vector<1x128xf32> to vector<128x128xf32>
    %8 = arith.addf %5, %7 : vector<128x128xf32>
    %cst_8 = arith.constant 0.000000e+00 : f32
    %9 = vector.broadcast %cst_8 : f32 to vector<128x128xf32>
    %10 = arith.cmpf ogt, %8, %9 : vector<128x128xf32>
    %c0_9 = arith.constant 0 : index
    %c0_10 = arith.constant 0 : index
    %11 = vector.load %arg5[%c0_9, %c0_10] : memref<1x128xf32, #tpu.memory_space<vmem>>, vector<1x128xf32>
    %12 = vector.broadcast %11 : vector<1x128xf32> to vector<128x128xf32>
    %13 = arith.mulf %12, %8 : vector<128x128xf32>
    %14 = arith.select %10, %8, %13 : vector<128x128xi1>, vector<128x128xf32>
    %15 = arith.truncf %14 : vector<128x128xf32> to vector<128x128xbf16>
    %cst_11 = arith.constant dense<0.000000e+00> : vector<128x128xf32>
    %16 = tpu.matmul %0, %15, %cst_11 {dimension_numbers = #tpu.dot_dimension_numbers<[1], [0], [0], [1], [0, 0, 1, 1], [], []>} : vector<128x128xbf16>, vector<128x128xbf16>, vector<128x128xf32> -> vector<128x128xf32>
    %17 = arith.truncf %16 : vector<128x128xf32> to vector<128x128xbf16>
    %c0_12 = arith.constant 0 : index
    %c0_13 = arith.constant 0 : index
    %18 = vector.load %arg6[%c0_12, %c0_13] : memref<128x128xbf16, #tpu.memory_space<vmem>>, vector<128x128xbf16>
    %cst_14 = arith.constant dense<0.000000e+00> : vector<128x128xf32>
    %19 = tpu.matmul %17, %18, %cst_14 {dimension_numbers = #tpu.dot_dimension_numbers<[1], [0], [0], [1], [0, 0, 1, 1], [], []>} : vector<128x128xbf16>, vector<128x128xbf16>, vector<128x128xf32> -> vector<128x128xf32>
    %c0_15 = arith.constant 0 : index
    %c0_16 = arith.constant 0 : index
    %20 = vector.load %arg7[%c0_15, %c0_16] : memref<1x128xf32, #tpu.memory_space<vmem>>, vector<1x128xf32>
    %21 = vector.broadcast %20 : vector<1x128xf32> to vector<128x128xf32>
    %22 = arith.addf %19, %21 : vector<128x128xf32>
    %cst_17 = arith.constant 0.000000e+00 : f32
    %23 = vector.broadcast %cst_17 : f32 to vector<128x128xf32>
    %24 = arith.cmpf ogt, %22, %23 : vector<128x128xf32>
    %c0_18 = arith.constant 0 : index
    %c0_19 = arith.constant 0 : index
    %25 = vector.load %arg8[%c0_18, %c0_19] : memref<1x128xf32, #tpu.memory_space<vmem>>, vector<1x128xf32>
    %26 = vector.broadcast %25 : vector<1x128xf32> to vector<128x128xf32>
    %27 = arith.mulf %26, %22 : vector<128x128xf32>
    %28 = arith.select %24, %22, %27 : vector<128x128xi1>, vector<128x128xf32>
    %c0_20 = arith.constant 0 : index
    %c0_21 = arith.constant 0 : index
    %29 = vector.load %arg9[%c0_20, %c0_21] : memref<128x128xf32, #tpu.memory_space<vmem>>, vector<128x128xf32>
    tpu.vector_store %arg9[%c0_20, %c0_21], %28 {strides = array<i32>} : memref<128x128xf32, #tpu.memory_space<vmem>>, vector<128x128xf32>,
    return
  }
  func.func @transform_0(%arg0: i32) -> (i32, i32) {
    %c0_i32 = arith.constant 0 : i32
    %c0_i32_0 = arith.constant 0 : i32
    %c0_i32_1 = arith.constant 0 : i32
    return %c0_i32, %c0_i32_0 : i32, i32
  }
  func.func @transform_1(%arg0: i32) -> (i32, i32) {
    %c0_i32 = arith.constant 0 : i32
    %c0_i32_0 = arith.constant 0 : i32
    %c0_i32_1 = arith.constant 0 : i32
    return %c0_i32, %c0_i32_0 : i32, i32
  }
  func.func @transform_2(%arg0: i32) -> (i32, i32) {
    %c0_i32 = arith.constant 0 : i32
    %c0_i32_0 = arith.constant 0 : i32
    %c0_i32_1 = arith.constant 0 : i32
    return %c0_i32, %c0_i32_0 : i32, i32
  }
  func.func @transform_3(%arg0: i32) -> (i32, i32) {
    %c0_i32 = arith.constant 0 : i32
    %c0_i32_0 = arith.constant 0 : i32
    %c0_i32_1 = arith.constant 0 : i32
    return %c0_i32, %c0_i32_0 : i32, i32
  }
  func.func @transform_4(%arg0: i32) -> (i32, i32) {
    %c0_i32 = arith.constant 0 : i32
    %c0_i32_0 = arith.constant 0 : i32
    %c0_i32_1 = arith.constant 0 : i32
    return %c0_i32, %c0_i32_0 : i32, i32
  }
  func.func @transform_5(%arg0: i32) -> (i32, i32) {
    %c0_i32 = arith.constant 0 : i32
    %c0_i32_0 = arith.constant 0 : i32
    %c0_i32_1 = arith.constant 0 : i32
    return %c0_i32, %c0_i32_0 : i32, i32
  }
  func.func @transform_6(%arg0: i32) -> (i32, i32) {
    %c0_i32 = arith.constant 0 : i32
    %c0_i32_0 = arith.constant 0 : i32
    %c0_i32_1 = arith.constant 0 : i32
    return %c0_i32, %c0_i32_0 : i32, i32
  }
  func.func @transform_7(%arg0: i32) -> (i32, i32) {
    %c0_i32 = arith.constant 0 : i32
    %c0_i32_0 = arith.constant 0 : i32
    %c0_i32_1 = arith.constant 0 : i32
    return %c0_i32, %c0_i32_0 : i32, i32
  }
  func.func @transform_8(%arg0: i32) -> (i32, i32) {
    %c0_i32 = arith.constant 0 : i32
    %c0_i32_0 = arith.constant 0 : i32
    %c0_i32_1 = arith.constant 0 : i32
    return %c0_i32, %c0_i32_0 : i32, i32
  }
}

</mosaic_0001>

<bundles_post_ra>
// kernel: tpu_custom_call.1
= control target key start
LH: loop header
LB: loop body
LE: loop exit
PB: predicated region body
PF: predicated region fallthrough
CT: control target
= control target key end

     0   :  { %13 = vsyncpa [#allocation3], 0  ;;  %s1552_s0 = inlined_call_operand.hbm [shape: bf16[128,128], index: 0, kind: input, shape index: {}]   ;;  %s1553_s1 = inlined_call_operand.hbm [shape: bf16[128,128], index: 1, kind: input, shape index: {}]   ;;  %s1554_s2 = inlined_call_operand.hbm [shape: bf16[128,128], index: 2, kind: input, shape index: {}]   ;;  %s1555_s3 = inlined_call_operand.vmem [shape: f32[1,128], index: 3, kind: input, shape index: {}]   ;;  %s1556_s4 = inlined_call_operand.vmem [shape: f32[1,128], index: 4, kind: input, shape index: {}]   ;;  %s1557_s5 = inlined_call_operand.hbm [shape: bf16[128,128], index: 5, kind: input, shape index: {}]   ;;  %s1558_s6 = inlined_call_operand.vmem [shape: f32[1,128], index: 6, kind: input, shape index: {}]   ;;  %s1559_s7 = inlined_call_operand.vmem [shape: f32[1,128], index: 7, kind: input, shape index: {}]   ;;  %s1560_s8 = inlined_call_operand.hbm [shape: f32[128,128], index: 8, kind: output, shape index: {}]  }
   0x1   :  { %14 = vsyncpa [#allocation6], 0 }
   0x2   :  { %15 = vsyncpa [#allocation9], 0 }
   0x3   :  { %16 = vsyncpa [#allocation4], 0  ;;  %s1300_s27 = smov [#allocation5]   ;;  %s1301_s29 = smov [#allocation2]  }
   0x4   :  { %s34_s28 = sshll.u32 %s1300_s27, 4  ;;  %s22_s30 = sshll.u32 %s1301_s29, 4  ;;  %s35_s28 = int_to_ptr.vmem [resolvable:$true] %s34_s28  ;;  %s1354_s30 = int_to_ptr.vmem [resolvable:$true] %s22_s30 }
   0x5   :  { %s1182_s11 = scalar_lea.hbm %s1553_s1, 1024 }
   0x6   :  { %p1183_p0 = scmp.ne.s32.totalorder %s1553_s1, %s1182_s11  ;;  %p1186_p1 = scmp.lt.u32.totalorder %s1182_s11, %s1553_s1 }
   0x8   :  { %p1188_p2 = pnand %p1186_p1, %p1183_p0 }
   0xa   :  { %1191 = shalt.err (!%p1188_p2)
}
   0xb   :  { %s1192_s16 = scalar_lea.vmem %s35_s28, 1024  ;;  %p1197_p4 = scmp.lt.s32.totalorder %s35_s28, %s35_s28 }
   0xc   :  { %p1193_p3 = scmp.ne.s32.totalorder %s35_s28, %s1192_s16  ;;  %p1198_p5 = scmp.lt.s32.totalorder %s1192_s16, %s1192_s16 }
   0xe   :  { %p1199_p6 = por %p1198_p5, %p1197_p4 }
  0x10   :  { %p1200_p7 = pnand %p1199_p6, %p1193_p3 }
  0x12   :  { %1203 = shalt.err (!%p1200_p7)
}
  0x13   :  { %s1302_s17 = smov 64   ;;  %s1303_s18 = smov 4  }
  0x14   :  { %40 = dma.hbm_to_vmem [thread:$0]  %s1553_s1, 1024, %s35_s28, [#allocation6], %s1302_s17, %s1302_s17, %s1303_s18  }
  0x15   :  { %s1204_s23 = scalar_lea.hbm %s1552_s0, 1024 }
  0x16   :  { %p1205_p8 = scmp.ne.s32.totalorder %s1552_s0, %s1204_s23  ;;  %p1208_p9 = scmp.lt.u32.totalorder %s1204_s23, %s1552_s0 }
  0x18   :  { %p1210_p10 = pnand %p1208_p9, %p1205_p8 }
  0x1a   :  { %1213 = shalt.err (!%p1210_p10)
}
  0x1b   :  { %s1214_s29 = scalar_lea.vmem %s1354_s30, 1024  ;;  %p1219_p12 = scmp.lt.s32.totalorder %s1354_s30, %s1354_s30 }
  0x1c   :  { %p1215_p11 = scmp.ne.s32.totalorder %s1354_s30, %s1214_s29  ;;  %p1220_p13 = scmp.lt.s32.totalorder %s1214_s29, %s1214_s29 }
  0x1e   :  { %p1221_p0 = por %p1220_p13, %p1219_p12 }
  0x20   :  { %p1222_p1 = pnand %p1221_p0, %p1215_p11 }
  0x22   :  { %1225 = shalt.err (!%p1222_p1)
}
  0x23   :  { %28 = dma.hbm_to_vmem [thread:$0]  %s1552_s0, 1024, %s1354_s30, [#allocation3], %s1302_s17, %s1302_s17, %s1303_s18  }
  0x24   :  { %s1304_s9 = smov [#allocation7]   ;;  %s1305_s11 = smov [#allocation8]  }
  0x25   :  { %s46_s10 = sshll.u32 %s1304_s9, 4  ;;  %s62_s12 = sshll.u32 %s1305_s11, 4  ;;  %s47_s10 = int_to_ptr.vmem [resolvable:$true] %s46_s10  ;;  %s1391_s12 = int_to_ptr.vmem [resolvable:$true] %s62_s12 }
  0x26   :  { %s1226_s15 = scalar_lea.hbm %s1554_s2, 1024 }
  0x27   :  { %p1227_p2 = scmp.ne.s32.totalorder %s1554_s2, %s1226_s15  ;;  %p1230_p3 = scmp.lt.u32.totalorder %s1226_s15, %s1554_s2 }
  0x29   :  { %p1232_p4 = pnand %p1230_p3, %p1227_p2 }
  0x2b   :  { %1235 = shalt.err (!%p1232_p4)
}
  0x2c   :  { %s1236_s0 = scalar_lea.vmem %s47_s10, 1024  ;;  %p1241_p6 = scmp.lt.s32.totalorder %s47_s10, %s47_s10 }
  0x2d   :  { %p1237_p5 = scmp.ne.s32.totalorder %s47_s10, %s1236_s0  ;;  %p1242_p7 = scmp.lt.s32.totalorder %s1236_s0, %s1236_s0 }
  0x2f   :  { %p1243_p8 = por %p1242_p7, %p1241_p6 }
  0x31   :  { %p1244_p9 = pnand %p1243_p8, %p1237_p5 }
  0x33   :  { %1247 = shalt.err (!%p1244_p9)
}
  0x34   :  { %52 = dma.hbm_to_vmem [thread:$0]  %s1554_s2, 1024, %s47_s10, [#allocation6], %s1302_s17, %s1302_s17, %s1303_s18  }
  0x35   :  { %s1248_s25 = scalar_lea.hbm %s1557_s5, 1024 }
  0x36   :  { %p1249_p10 = scmp.ne.s32.totalorder %s1557_s5, %s1248_s25  ;;  %p1252_p11 = scmp.lt.u32.totalorder %s1248_s25, %s1557_s5 }
  0x38   :  { %p1254_p12 = pnand %p1252_p11, %p1249_p10 }
  0x3a   :  { %1257 = shalt.err (!%p1254_p12)
}
  0x3b   :  { %s1258_s28 = scalar_lea.vmem %s1391_s12, 1024  ;;  %p1263_p0 = scmp.lt.s32.totalorder %s1391_s12, %s1391_s12 }
  0x3c   :  { %p1259_p13 = scmp.ne.s32.totalorder %s1391_s12, %s1258_s28  ;;  %p1264_p1 = scmp.lt.s32.totalorder %s1258_s28, %s1258_s28 }
  0x3e   :  { %p1265_p2 = por %p1264_p1, %p1263_p0 }
  0x40   :  { %p1266_p3 = pnand %p1265_p2, %p1259_p13 }
  0x42   :  { %1269 = shalt.err (!%p1266_p3)
}
  0x43   :  { %68 = dma.hbm_to_vmem [thread:$0]  %s1557_s5, 1024, %s1391_s12, [#allocation9], %s1302_s17, %s1302_s17, %s1303_s18  }
  0x44   :  { %1292 = dma.done.wait [#allocation3], 1024  }
  0x45   :  { %1293 = vsyncadd [#allocation3], 4294966272 }
  0x46   :  { %1294 = dma.done.wait [#allocation6], 2048  }
  0x47   :  { %1295 = vsyncadd [#allocation6], 4294965248 }
  0x48   :  { %1296 = dma.done.wait [#allocation9], 1024  }
  0x49   :  { %1297 = vsyncadd [#allocation9], 4294966272  ;;  %v1150_v0 = vld [vmem:[#allocation5] sm:$0xff]   ;;  %v1151_v1 = vld [vmem:[#allocation5 + $0x8] sm:$0xff]  }
  0x4a   :  { %1013 = vmatprep.subr.bf16.mxu0 %v1150_v0  ;;  %v1152_v2 = vld [vmem:[#allocation5 + $0x10] sm:$0xff]   ;;  %v1153_v3 = vld [vmem:[#allocation5 + $0x18] sm:$0xff]   ;;  %v1158_v4 = vld [vmem:[#allocation2] sm:$0xff]  }
  0x4b   :  { %1014 = vmatpush3.bf16.msra.mxu0 %v1150_v0  ;;  %1029 = vmatprep.mubr.bf16.mxu0 %v1158_v4  ;;  %v1154_v5 = vld [vmem:[#allocation5 + $0x20] sm:$0xff]   ;;  %v1155_v6 = vld [vmem:[#allocation5 + $0x28] sm:$0xff]   ;;  %v1156_v9 = vld [vmem:[#allocation5 + $0x30] sm:$0xff]  }
  0x4c   :  { %1015 = vmatprep.subr.bf16.mxu0 %v1151_v1  ;;  %v1166_v7 = vld [vmem:[#allocation7] sm:$0xff]   ;;  %v1167_v8 = vld [vmem:[#allocation7 + $0x8] sm:$0xff]   ;;  %v1168_v10 = vld [vmem:[#allocation7 + $0x10] sm:$0xff]  }
  0x4d   :  { %1045 = vmatprep.subr.bf16.mxu1 %v1166_v7  ;;  %v1157_v11 = vld [vmem:[#allocation5 + $0x38] sm:$0xff]   ;;  %v1170_v13 = vld [vmem:[#allocation7 + $0x20] sm:$0xff]   ;;  %v1428_v14 = vld [vmem:[#allocation2 + $0x8] sm:$0xff]  }
  0x4e   :  { %1046 = vmatpush3.bf16.msra.mxu1 %v1166_v7  ;;  %v1169_v12 = vld [vmem:[#allocation7 + $0x18] sm:$0xff]   ;;  %v1430_v15 = vld [vmem:[#allocation2 + $0x10] sm:$0xff]   ;;  %v1171_v16 = vld [vmem:[#allocation7 + $0x28] sm:$0xff]  }
  0x4f   :  { %1016 = vmatpush3.bf16.msra.mxu0 %v1151_v1  ;;  %1047 = vmatprep.subr.bf16.mxu1 %v1167_v8  ;;  %v1172_v17 = vld [vmem:[#allocation7 + $0x30] sm:$0xff]   ;;  %v1434_v18 = vld [vmem:[#allocation2 + $0x18] sm:$0xff]   ;;  %v1436_v19 = vld [vmem:[#allocation2 + $0x20] sm:$0xff]  }
  0x50   :  { %1017 = vmatprep.subr.bf16.mxu0 %v1152_v2  ;;  %v1440_v20 = vld [vmem:[#allocation2 + $0x28] sm:$0xff]   ;;  %v1442_v21 = vld [vmem:[#allocation2 + $0x30] sm:$0xff]   ;;  %v1446_v22 = vld [vmem:[#allocation2 + $0x38] sm:$0xff]  }
  0x51   :  { %v1173_v23 = vld [vmem:[#allocation7 + $0x38] sm:$0xff]   ;;  %v1174_v48 = vld [vmem:[#allocation8] sm:$0xff]   ;;  %v1175_v49 = vld [vmem:[#allocation8 + $0x8] sm:$0xff]  }
  0x52   :  { %1048 = vmatpush3.bf16.msra.mxu1 %v1167_v8  ;;  %v1176_v50 = vld [vmem:[#allocation8 + $0x10] sm:$0xff]   ;;  %v1177_v51 = vld [vmem:[#allocation8 + $0x18] sm:$0xff]   ;;  %v1178_v52 = vld [vmem:[#allocation8 + $0x20] sm:$0xff]  }
  0x53   :  { %1018 = vmatpush3.bf16.msra.mxu0 %v1152_v2  ;;  %1049 = vmatprep.subr.bf16.mxu1 %v1168_v10  ;;  %v1179_v53 = vld [vmem:[#allocation8 + $0x28] sm:$0xff]   ;;  %v1180_v54 = vld [vmem:[#allocation8 + $0x30] sm:$0xff]   ;;  %v1452_v55 = vld [vmem:[%s1555_s3] ss:$0 sm:$0xff] }
  0x54   :  { %1019 = vmatprep.subr.bf16.mxu0 %v1153_v3  ;;  %v1457_v57 = vld [vmem:[%s1556_s4] ss:$0 sm:$0xff] }
  0x56   :  { %1050 = vmatpush3.bf16.msra.mxu1 %v1168_v10 }
  0x57   :  { %1020 = vmatpush3.bf16.msra.mxu0 %v1153_v3  ;;  %1051 = vmatprep.subr.bf16.mxu1 %v1169_v12 }
  0x58   :  { %1021 = vmatprep.subr.bf16.mxu0 %v1154_v5 }
  0x5a   :  { %1052 = vmatpush3.bf16.msra.mxu1 %v1169_v12 }
  0x5b   :  { %1022 = vmatpush3.bf16.msra.mxu0 %v1154_v5  ;;  %1053 = vmatprep.subr.bf16.mxu1 %v1170_v13 }
  0x5c   :  { %1023 = vmatprep.subr.bf16.mxu0 %v1155_v6 }
  0x5e   :  { %1054 = vmatpush3.bf16.msra.mxu1 %v1170_v13 }
  0x5f   :  { %1024 = vmatpush3.bf16.msra.mxu0 %v1155_v6  ;;  %1055 = vmatprep.subr.bf16.mxu1 %v1171_v16 }
  0x60   :  { %1025 = vmatprep.subr.bf16.mxu0 %v1156_v9 }
  0x62   :  { %1056 = vmatpush3.bf16.msra.mxu1 %v1171_v16 }
  0x63   :  { %1026 = vmatpush3.bf16.msra.mxu0 %v1156_v9  ;;  %1057 = vmatprep.subr.bf16.mxu1 %v1172_v17 }
  0x64   :  { %1027 = vmatprep.subr.bf16.mxu0 %v1157_v11 }
  0x66   :  { %1058 = vmatpush3.bf16.msra.mxu1 %v1172_v17 }
  0x67   :  { %1028 = vmatpush3.bf16.msra.mxu0 %v1157_v11  ;;  %1059 = vmatprep.subr.bf16.mxu1 %v1173_v23 }
  0x6a   :  { %1030 = vmatmul.mubr.bf16.vlgmr.msra.gmra.mrb[0].mxu0 %v1428_v14  ;;  %1060 = vmatpush3.bf16.msra.mxu1 %v1173_v23 }
  0x6b   :  { %1033 = vmatprep.mubr.bf16.mxu0 %v1430_v15  ;;  %1109 = vmatprep.subr.bf16.mxu1 %v1174_v48 }
  0x72   :  { %1034 = vmatmul.mubr.bf16.gmra.mrb[4].mxu0 %v1434_v18 }
  0x73   :  { %1037 = vmatprep.mubr.bf16.mxu0 %v1436_v19 }
  0x7a   :  { %1038 = vmatmul.mubr.bf16.gmra.mrb[8].mxu0 %v1440_v20 }
  0x7b   :  { %1041 = vmatprep.mubr.bf16.mxu0 %v1442_v21 }
  0x82   :  { %1042 = vmatmul.mubr.bf16.gmra.mrb[12].mxu0 %v1446_v22 }
  0x83   :  { %1093 = vmatprep.mubr.bf16.mxu0 %v1158_v4 }
 0x13d   :  { %v1031_v24 = vpop.f32.mrb[0].mxu0 }
 0x13e   :  { %v248_v25 = vpop.f32.mrb[1].mxu0 }
 0x13f   :  { %v1032_v26 = vpop.f32.mrb[2].mxu0 }
 0x140   :  { %v312_v27 = vpack.c.bf16 %v1032_v26, %v1031_v24  ;;  %v251_v28 = vpop.f32.mrb[3].mxu0 }
 0x141   :  { %v311_v29 = vpack.c.bf16 %v251_v28, %v248_v25 }
 0x143   :  { %1061 = vmatprep.mubr.bf16.mxu1 %v311_v29 }
 0x144   :  { %1062 = vmatmul.mubr.bf16.vlgmr.msra.gmra.mrb[0].mxu1 %v312_v27 }
 0x145   :  { %v1035_v30 = vpop.f32.mrb[4].mxu0  ;;  %1110 = vmatpush3.bf16.msra.mxu1 %v1174_v48 }
 0x146   :  { %v264_v31 = vpop.f32.mrb[5].mxu0  ;;  %1111 = vmatprep.subr.bf16.mxu1 %v1175_v49 }
 0x147   :  { %v1036_v32 = vpop.f32.mrb[6].mxu0 }
 0x148   :  { %v314_v33 = vpack.c.bf16 %v1036_v32, %v1035_v30  ;;  %v267_v34 = vpop.f32.mrb[7].mxu0 }
 0x149   :  { %v313_v35 = vpack.c.bf16 %v267_v34, %v264_v31  ;;  %1112 = vmatpush3.bf16.msra.mxu1 %v1175_v49 }
 0x14a   :  { %1113 = vmatprep.subr.bf16.mxu1 %v1176_v50 }
 0x14b   :  { %1065 = vmatprep.mubr.bf16.mxu1 %v313_v35 }
 0x14c   :  { %1066 = vmatmul.mubr.bf16.gmra.mrb[4].mxu1 %v314_v33 }
 0x14d   :  { %v1039_v36 = vpop.f32.mrb[8].mxu0  ;;  %1114 = vmatpush3.bf16.msra.mxu1 %v1176_v50 }
 0x14e   :  { %v280_v37 = vpop.f32.mrb[9].mxu0  ;;  %1115 = vmatprep.subr.bf16.mxu1 %v1177_v51 }
 0x14f   :  { %v1040_v38 = vpop.f32.mrb[10].mxu0 }
 0x150   :  { %v316_v39 = vpack.c.bf16 %v1040_v38, %v1039_v36  ;;  %v283_v40 = vpop.f32.mrb[11].mxu0 }
 0x151   :  { %v315_v41 = vpack.c.bf16 %v283_v40, %v280_v37  ;;  %1116 = vmatpush3.bf16.msra.mxu1 %v1177_v51 }
 0x152   :  { %1117 = vmatprep.subr.bf16.mxu1 %v1178_v52 }
 0x153   :  { %1069 = vmatprep.mubr.bf16.mxu1 %v315_v41 }
 0x154   :  { %1070 = vmatmul.mubr.bf16.gmra.mrb[8].mxu1 %v316_v39 }
 0x155   :  { %v1043_v42 = vpop.f32.mrb[12].mxu0  ;;  %1118 = vmatpush3.bf16.msra.mxu1 %v1178_v52 }
 0x156   :  { %v296_v43 = vpop.f32.mrb[13].mxu0  ;;  %1119 = vmatprep.subr.bf16.mxu1 %v1179_v53 }
 0x157   :  { %v1044_v44 = vpop.f32.mrb[14].mxu0 }
 0x158   :  { %v318_v45 = vpack.c.bf16 %v1044_v44, %v1043_v42  ;;  %v299_v46 = vpop.f32.mrb[15].mxu0 }
 0x159   :  { %v317_v47 = vpack.c.bf16 %v299_v46, %v296_v43  ;;  %1120 = vmatpush3.bf16.msra.mxu1 %v1179_v53 }
 0x15a   :  { %1121 = vmatprep.subr.bf16.mxu1 %v1180_v54 }
 0x15b   :  { %1073 = vmatprep.mubr.bf16.mxu1 %v317_v47 }
 0x15c   :  { %1074 = vmatmul.mubr.bf16.gmra.mrb[12].mxu1 %v318_v45 }
 0x15d   :  { %1122 = vmatpush3.bf16.msra.mxu1 %v1180_v54 }
 0x217   :  { %v1063_v56 = vpop.f32.mrb[0].mxu1 }
 0x218   :  { %v433_v58 = vadd.f32 %v1063_v56, %v1452_v55  ;;  %v424_v59 = vpop.f32.mrb[1].mxu1 }
 0x219   :  { %v425_v60 = vadd.f32 %v1452_v55, %v424_v59  ;;  %v1064_v61 = vpop.f32.mrb[2].mxu1 }
 0x21a   :  { %v512_v62 = vmul.f32 %v1457_v57, %v433_v58  ;;  %v436_v63 = vadd.f32 %v1064_v61, %v1452_v55  ;;  %v427_v0 = vpop.f32.mrb[3].mxu1  ;;  %vm489_vm0 = vcmp.gt.f32.partialorder %v433_v58, 0.0 }
 0x21b   :  { %v510_v1 = vmul.f32 %v1457_v57, %v425_v60  ;;  %v428_v2 = vadd.f32 %v1452_v55, %v427_v0  ;;  %vm487_vm1 = vcmp.gt.f32.partialorder %v425_v60, 0.0 }
 0x21c   :  { %vm490_vm2 = vcmp.gt.f32.partialorder %v436_v63, 0.0  ;;  %v513_v3 = vmul.f32 %v1457_v57, %v436_v63  ;;  %v528_v5 = vsel %vm489_vm0, %v433_v58, %v512_v62 }
 0x21d   :  { %vm488_vm3 = vcmp.gt.f32.partialorder %v428_v2, 0.0  ;;  %v511_v4 = vmul.f32 %v1457_v57, %v428_v2  ;;  %v526_v8 = vsel %vm487_vm1, %v425_v60, %v510_v1 }
 0x21e   :  { %v529_v6 = vsel %vm490_vm2, %v436_v63, %v513_v3 }
 0x21f   :  { %v1067_v7 = vpop.f32.mrb[4].mxu1  ;;  %v527_v9 = vsel %vm488_vm3, %v428_v2, %v511_v4  ;;  %v543_v10 = vpack.c.bf16 %v529_v6, %v528_v5 }
 0x220   :  { %v449_v11 = vadd.f32 %v1067_v7, %v1452_v55  ;;  %v440_v12 = vpop.f32.mrb[5].mxu1  ;;  %v542_v13 = vpack.c.bf16 %v527_v9, %v526_v8 }
 0x221   :  { %v441_v16 = vadd.f32 %v1452_v55, %v440_v12  ;;  %v1068_v17 = vpop.f32.mrb[6].mxu1 }
 0x222   :  { %v516_v23 = vmul.f32 %v1457_v57, %v449_v11  ;;  %v452_v24 = vadd.f32 %v1068_v17, %v1452_v55  ;;  %v443_v25 = vpop.f32.mrb[7].mxu1  ;;  %1077 = vmatprep.subr.bf16.mxu0 %v542_v13  ;;  %vm493_vm4 = vcmp.gt.f32.partialorder %v449_v11, 0.0 }
 0x223   :  { %v514_v26 = vmul.f32 %v1457_v57, %v441_v16  ;;  %v444_v27 = vadd.f32 %v1452_v55, %v443_v25  ;;  %1078 = vmatpush3.bf16.msra.mxu0 %v542_v13  ;;  %vm491_vm5 = vcmp.gt.f32.partialorder %v441_v16, 0.0 }
 0x224   :  { %vm494_vm6 = vcmp.gt.f32.partialorder %v452_v24, 0.0  ;;  %v517_v28 = vmul.f32 %v1457_v57, %v452_v24  ;;  %1079 = vmatprep.subr.bf16.mxu0 %v543_v10  ;;  %v532_v30 = vsel %vm493_vm4, %v449_v11, %v516_v23 }
 0x225   :  { %vm492_vm7 = vcmp.gt.f32.partialorder %v444_v27, 0.0  ;;  %v515_v29 = vmul.f32 %v1457_v57, %v444_v27  ;;  %v530_v33 = vsel %vm491_vm5, %v441_v16, %v514_v26 }
 0x226   :  { %v533_v31 = vsel %vm494_vm6, %v452_v24, %v517_v28 }
 0x227   :  { %v1071_v32 = vpop.f32.mrb[8].mxu1  ;;  %1080 = vmatpush3.bf16.msra.mxu0 %v543_v10  ;;  %v531_v34 = vsel %vm492_vm7, %v444_v27, %v515_v29  ;;  %v545_v35 = vpack.c.bf16 %v533_v31, %v532_v30 }
 0x228   :  { %v465_v36 = vadd.f32 %v1071_v32, %v1452_v55  ;;  %v456_v37 = vpop.f32.mrb[9].mxu1  ;;  %v544_v38 = vpack.c.bf16 %v531_v34, %v530_v33  ;;  %v1501_v33 = vld [vmem:[%s1558_s6] ss:$0 sm:$0xff]  ;;  %s1306_s6 = smov [#allocation10]  }
 0x229   :  { %v457_v39 = vadd.f32 %v1452_v55, %v456_v37  ;;  %v1072_v40 = vpop.f32.mrb[10].mxu1 }
 0x22a   :  { %v520_v41 = vmul.f32 %v1457_v57, %v465_v36  ;;  %v468_v42 = vadd.f32 %v1072_v40, %v1452_v55  ;;  %v459_v43 = vpop.f32.mrb[11].mxu1  ;;  %1081 = vmatprep.subr.bf16.mxu0 %v544_v38  ;;  %vm497_vm8 = vcmp.gt.f32.partialorder %v465_v36, 0.0 }
 0x22b   :  { %v518_v44 = vmul.f32 %v1457_v57, %v457_v39  ;;  %v460_v45 = vadd.f32 %v1452_v55, %v459_v43  ;;  %1082 = vmatpush3.bf16.msra.mxu0 %v544_v38  ;;  %vm495_vm9 = vcmp.gt.f32.partialorder %v457_v39, 0.0 }
 0x22c   :  { %vm498_vm10 = vcmp.gt.f32.partialorder %v468_v42, 0.0  ;;  %v521_v46 = vmul.f32 %v1457_v57, %v468_v42  ;;  %1083 = vmatprep.subr.bf16.mxu0 %v545_v35  ;;  %v536_v48 = vsel %vm497_vm8, %v465_v36, %v520_v41 }
 0x22d   :  { %vm496_vm11 = vcmp.gt.f32.partialorder %v460_v45, 0.0  ;;  %v519_v47 = vmul.f32 %v1457_v57, %v460_v45  ;;  %v534_v51 = vsel %vm495_vm9, %v457_v39, %v518_v44 }
 0x22e   :  { %v537_v49 = vsel %vm498_vm10, %v468_v42, %v521_v46 }
 0x22f   :  { %v1075_v50 = vpop.f32.mrb[12].mxu1  ;;  %1084 = vmatpush3.bf16.msra.mxu0 %v545_v35  ;;  %v535_v52 = vsel %vm496_vm11, %v460_v45, %v519_v47  ;;  %v547_v53 = vpack.c.bf16 %v537_v49, %v536_v48  ;;  %v1506_v35 = vld [vmem:[%s1559_s7] ss:$0 sm:$0xff]  ;;  %s899_s7 = sshll.u32 %s1306_s6, 4  ;;  %s900_s7 = int_to_ptr.vmem [resolvable:$true] %s899_s7 }
 0x230   :  { %v481_v54 = vadd.f32 %v1075_v50, %v1452_v55  ;;  %v472_v56 = vpop.f32.mrb[13].mxu1  ;;  %v546_v58 = vpack.c.bf16 %v535_v52, %v534_v51  ;;  %s1270_s13 = scalar_lea.vmem %s900_s7, 2048  ;;  %p1275_p5 = scmp.lt.s32.totalorder %s900_s7, %s900_s7 }
 0x231   :  { %v473_v59 = vadd.f32 %v1452_v55, %v472_v56  ;;  %v1076_v60 = vpop.f32.mrb[14].mxu1  ;;  %p1271_p4 = scmp.ne.s32.totalorder %s900_s7, %s1270_s13  ;;  %p1276_p6 = scmp.lt.s32.totalorder %s1270_s13, %s1270_s13 }
 0x232   :  { %v524_v61 = vmul.f32 %v1457_v57, %v481_v54  ;;  %v484_v62 = vadd.f32 %v1076_v60, %v1452_v55  ;;  %v475_v63 = vpop.f32.mrb[15].mxu1  ;;  %1085 = vmatprep.subr.bf16.mxu0 %v546_v58  ;;  %vm501_vm12 = vcmp.gt.f32.partialorder %v481_v54, 0.0 }
 0x233   :  { %v522_v0 = vmul.f32 %v1457_v57, %v473_v59  ;;  %v476_v1 = vadd.f32 %v1452_v55, %v475_v63  ;;  %1086 = vmatpush3.bf16.msra.mxu0 %v546_v58  ;;  %vm499_vm13 = vcmp.gt.f32.partialorder %v473_v59, 0.0  ;;  %v1181_v55 = vld [vmem:[#allocation8 + $0x38] sm:$0xff]   ;;  %p1277_p7 = por %p1276_p6, %p1275_p5 }
 0x234   :  { %vm502_vm14 = vcmp.gt.f32.partialorder %v484_v62, 0.0  ;;  %v525_v2 = vmul.f32 %v1457_v57, %v484_v62  ;;  %1087 = vmatprep.subr.bf16.mxu0 %v547_v53  ;;  %v540_v4 = vsel %vm501_vm12, %v481_v54, %v524_v61  ;;  %1123 = vmatprep.subr.bf16.mxu1 %v1181_v55 }
 0x235   :  { %vm500_vm15 = vcmp.gt.f32.partialorder %v476_v1, 0.0  ;;  %v523_v3 = vmul.f32 %v1457_v57, %v476_v1  ;;  %v538_v6 = vsel %vm499_vm13, %v473_v59, %v522_v0  ;;  %1124 = vmatpush3.bf16.msra.mxu1 %v1181_v55  ;;  %p1278_p8 = pnand %p1277_p7, %p1271_p4 }
 0x236   :  { %v541_v5 = vsel %vm502_vm14, %v484_v62, %v525_v2 }
 0x237   :  { %1088 = vmatpush3.bf16.msra.mxu0 %v547_v53  ;;  %v539_v7 = vsel %vm500_vm15, %v476_v1, %v523_v3  ;;  %v549_v8 = vpack.c.bf16 %v541_v5, %v540_v4 }
 0x238   :  { %v548_v9 = vpack.c.bf16 %v539_v7, %v538_v6 }
 0x23a   :  { %1089 = vmatprep.subr.bf16.mxu0 %v548_v9 }
 0x23b   :  { %1090 = vmatpush3.bf16.msra.mxu0 %v548_v9 }
 0x23c   :  { %1091 = vmatprep.subr.bf16.mxu0 %v549_v8 }
 0x23f   :  { %1092 = vmatpush3.bf16.msra.mxu0 %v549_v8 }
 0x242   :  { %1094 = vmatmul.mubr.bf16.vlgmr.msra.gmra.mrb[16].mxu0 %v1428_v14 }
 0x243   :  { %1097 = vmatprep.mubr.bf16.mxu0 %v1430_v15 }
 0x24a   :  { %1098 = vmatmul.mubr.bf16.gmra.mrb[20].mxu0 %v1434_v18 }
 0x24b   :  { %1101 = vmatprep.mubr.bf16.mxu0 %v1436_v19 }
 0x252   :  { %1102 = vmatmul.mubr.bf16.gmra.mrb[24].mxu0 %v1440_v20 }
 0x253   :  { %1105 = vmatprep.mubr.bf16.mxu0 %v1442_v21 }
 0x25a   :  { %1106 = vmatmul.mubr.bf16.gmra.mrb[28].mxu0 %v1446_v22 }
 0x315   :  { %v1095_v57 = vpop.f32.mrb[16].mxu0 }
 0x316   :  { %v584_v10 = vpop.f32.mrb[17].mxu0 }
 0x317   :  { %v1096_v11 = vpop.f32.mrb[18].mxu0 }
 0x318   :  { %v648_v12 = vpack.c.bf16 %v1096_v11, %v1095_v57  ;;  %v587_v14 = vpop.f32.mrb[19].mxu0 }
 0x319   :  { %v647_v13 = vpack.c.bf16 %v587_v14, %v584_v10 }
 0x31b   :  { %1125 = vmatprep.mubr.bf16.mxu1 %v647_v13 }
 0x31c   :  { %1126 = vmatmul.mubr.bf16.vlgmr.msra.gmra.mrb[16].mxu1 %v648_v12 }
 0x31d   :  { %v1099_v15 = vpop.f32.mrb[20].mxu0 }
 0x31e   :  { %v600_v18 = vpop.f32.mrb[21].mxu0 }
 0x31f   :  { %v1100_v19 = vpop.f32.mrb[22].mxu0 }
 0x320   :  { %v650_v16 = vpack.c.bf16 %v1100_v19, %v1099_v15  ;;  %v603_v20 = vpop.f32.mrb[23].mxu0 }
 0x321   :  { %v649_v17 = vpack.c.bf16 %v603_v20, %v600_v18 }
 0x323   :  { %1129 = vmatprep.mubr.bf16.mxu1 %v649_v17 }
 0x324   :  { %1130 = vmatmul.mubr.bf16.gmra.mrb[20].mxu1 %v650_v16 }
 0x325   :  { %v1103_v21 = vpop.f32.mrb[24].mxu0 }
 0x326   :  { %v616_v22 = vpop.f32.mrb[25].mxu0 }
 0x327   :  { %v1104_v23 = vpop.f32.mrb[26].mxu0 }
 0x328   :  { %v652_v24 = vpack.c.bf16 %v1104_v23, %v1103_v21  ;;  %v619_v25 = vpop.f32.mrb[27].mxu0 }
 0x329   :  { %v651_v26 = vpack.c.bf16 %v619_v25, %v616_v22 }
 0x32b   :  { %1133 = vmatprep.mubr.bf16.mxu1 %v651_v26 }
 0x32c   :  { %1134 = vmatmul.mubr.bf16.gmra.mrb[24].mxu1 %v652_v24 }
 0x32d   :  { %v1107_v27 = vpop.f32.mrb[28].mxu0 }
 0x32e   :  { %v632_v28 = vpop.f32.mrb[29].mxu0 }
 0x32f   :  { %v1108_v29 = vpop.f32.mrb[30].mxu0 }
 0x330   :  { %v654_v30 = vpack.c.bf16 %v1108_v29, %v1107_v27  ;;  %v635_v31 = vpop.f32.mrb[31].mxu0 }
 0x331   :  { %v653_v32 = vpack.c.bf16 %v635_v31, %v632_v28 }
 0x333   :  { %1137 = vmatprep.mubr.bf16.mxu1 %v653_v32 }
 0x334   :  { %1138 = vmatmul.mubr.bf16.gmra.mrb[28].mxu1 %v654_v30 }
 0x3ef   :  { %v1127_v34 = vpop.f32.mrb[16].mxu1 }
 0x3f0   :  { %v769_v36 = vadd.f32 %v1127_v34, %v1501_v33  ;;  %v760_v37 = vpop.f32.mrb[17].mxu1 }
 0x3f1   :  { %v761_v38 = vadd.f32 %v1501_v33, %v760_v37  ;;  %v1128_v39 = vpop.f32.mrb[18].mxu1 }
 0x3f2   :  { %vm825_vm0 = vcmp.gt.f32.partialorder %v769_v36, 0.0  ;;  %v848_v40 = vmul.f32 %v1506_v35, %v769_v36  ;;  %v772_v41 = vadd.f32 %v1128_v39, %v1501_v33  ;;  %v763_v42 = vpop.f32.mrb[19].mxu1 }
 0x3f3   :  { %vm823_vm1 = vcmp.gt.f32.partialorder %v761_v38, 0.0  ;;  %v846_v43 = vmul.f32 %v1506_v35, %v761_v38  ;;  %v764_v44 = vadd.f32 %v1501_v33, %v763_v42 }
 0x3f4   :  { %v864_v45 = vsel %vm825_vm0, %v769_v36, %v848_v40  ;;  %vm826_vm2 = vcmp.gt.f32.partialorder %v772_v41, 0.0  ;;  %v849_v46 = vmul.f32 %v1506_v35, %v772_v41 }
 0x3f5   :  { %880 = vst [vmem:[#allocation10 + $0x10] sm:$0xff] %v864_v45  ;;  %v862_v47 = vsel %vm823_vm1, %v761_v38, %v846_v43  ;;  %vm824_vm3 = vcmp.gt.f32.partialorder %v764_v44, 0.0  ;;  %v847_v48 = vmul.f32 %v1506_v35, %v764_v44 }
 0x3f6   :  { %878 = vst [vmem:[#allocation10] sm:$0xff] %v862_v47  ;;  %v865_v49 = vsel %vm826_vm2, %v772_v41, %v849_v46 }
 0x3f7   :  { %881 = vst [vmem:[#allocation10 + $0x18] sm:$0xff] %v865_v49  ;;  %v863_v50 = vsel %vm824_vm3, %v764_v44, %v847_v48  ;;  %v1131_v51 = vpop.f32.mrb[20].mxu1 }
 0x3f8   :  { %879 = vst [vmem:[#allocation10 + $0x8] sm:$0xff] %v863_v50  ;;  %v785_v52 = vadd.f32 %v1131_v51, %v1501_v33  ;;  %v776_v53 = vpop.f32.mrb[21].mxu1 }
 0x3f9   :  { %v777_v54 = vadd.f32 %v1501_v33, %v776_v53  ;;  %v1132_v56 = vpop.f32.mrb[22].mxu1 }
 0x3fa   :  { %vm829_vm4 = vcmp.gt.f32.partialorder %v785_v52, 0.0  ;;  %v852_v58 = vmul.f32 %v1506_v35, %v785_v52  ;;  %v788_v59 = vadd.f32 %v1132_v56, %v1501_v33  ;;  %v779_v60 = vpop.f32.mrb[23].mxu1 }
 0x3fb   :  { %vm827_vm5 = vcmp.gt.f32.partialorder %v777_v54, 0.0  ;;  %v850_v61 = vmul.f32 %v1506_v35, %v777_v54  ;;  %v780_v62 = vadd.f32 %v1501_v33, %v779_v60 }
 0x3fc   :  { %v868_v63 = vsel %vm829_vm4, %v785_v52, %v852_v58  ;;  %vm830_vm6 = vcmp.gt.f32.partialorder %v788_v59, 0.0  ;;  %v853_v0 = vmul.f32 %v1506_v35, %v788_v59 }
 0x3fd   :  { %884 = vst [vmem:[#allocation10 + $0x30] sm:$0xff] %v868_v63  ;;  %v866_v1 = vsel %vm827_vm5, %v777_v54, %v850_v61  ;;  %vm828_vm7 = vcmp.gt.f32.partialorder %v780_v62, 0.0  ;;  %v851_v2 = vmul.f32 %v1506_v35, %v780_v62 }
 0x3fe   :  { %882 = vst [vmem:[#allocation10 + $0x20] sm:$0xff] %v866_v1  ;;  %v869_v3 = vsel %vm830_vm6, %v788_v59, %v853_v0 }
 0x3ff   :  { %885 = vst [vmem:[#allocation10 + $0x38] sm:$0xff] %v869_v3  ;;  %v867_v4 = vsel %vm828_vm7, %v780_v62, %v851_v2  ;;  %v1135_v5 = vpop.f32.mrb[24].mxu1 }
 0x400   :  { %883 = vst [vmem:[#allocation10 + $0x28] sm:$0xff] %v867_v4  ;;  %v801_v6 = vadd.f32 %v1135_v5, %v1501_v33  ;;  %v792_v7 = vpop.f32.mrb[25].mxu1 }
 0x401   :  { %v793_v8 = vadd.f32 %v1501_v33, %v792_v7  ;;  %v1136_v9 = vpop.f32.mrb[26].mxu1 }
 0x402   :  { %vm833_vm8 = vcmp.gt.f32.partialorder %v801_v6, 0.0  ;;  %v856_v55 = vmul.f32 %v1506_v35, %v801_v6  ;;  %v804_v57 = vadd.f32 %v1136_v9, %v1501_v33  ;;  %v795_v10 = vpop.f32.mrb[27].mxu1 }
 0x403   :  { %vm831_vm9 = vcmp.gt.f32.partialorder %v793_v8, 0.0  ;;  %v854_v11 = vmul.f32 %v1506_v35, %v793_v8  ;;  %v796_v12 = vadd.f32 %v1501_v33, %v795_v10 }
 0x404   :  { %v872_v14 = vsel %vm833_vm8, %v801_v6, %v856_v55  ;;  %vm834_vm10 = vcmp.gt.f32.partialorder %v804_v57, 0.0  ;;  %v857_v13 = vmul.f32 %v1506_v35, %v804_v57 }
 0x405   :  { %888 = vst [vmem:[#allocation10 + $0x50] sm:$0xff] %v872_v14  ;;  %v870_v15 = vsel %vm831_vm9, %v793_v8, %v854_v11  ;;  %vm832_vm11 = vcmp.gt.f32.partialorder %v796_v12, 0.0  ;;  %v855_v18 = vmul.f32 %v1506_v35, %v796_v12 }
 0x406   :  { %886 = vst [vmem:[#allocation10 + $0x40] sm:$0xff] %v870_v15  ;;  %v873_v19 = vsel %vm834_vm10, %v804_v57, %v857_v13 }
 0x407   :  { %889 = vst [vmem:[#allocation10 + $0x58] sm:$0xff] %v873_v19  ;;  %v871_v16 = vsel %vm832_vm11, %v796_v12, %v855_v18  ;;  %v1139_v20 = vpop.f32.mrb[28].mxu1 }
 0x408   :  { %887 = vst [vmem:[#allocation10 + $0x48] sm:$0xff] %v871_v16  ;;  %v817_v17 = vadd.f32 %v1139_v20, %v1501_v33  ;;  %v808_v21 = vpop.f32.mrb[29].mxu1 }
 0x409   :  { %v809_v22 = vadd.f32 %v1501_v33, %v808_v21  ;;  %v1140_v23 = vpop.f32.mrb[30].mxu1 }
 0x40a   :  { %vm837_vm12 = vcmp.gt.f32.partialorder %v817_v17, 0.0  ;;  %v860_v24 = vmul.f32 %v1506_v35, %v817_v17  ;;  %v820_v25 = vadd.f32 %v1140_v23, %v1501_v33  ;;  %v811_v26 = vpop.f32.mrb[31].mxu1 }
 0x40b   :  { %vm835_vm13 = vcmp.gt.f32.partialorder %v809_v22, 0.0  ;;  %v858_v27 = vmul.f32 %v1506_v35, %v809_v22  ;;  %v812_v28 = vadd.f32 %v1501_v33, %v811_v26 }
 0x40c   :  { %v876_v29 = vsel %vm837_vm12, %v817_v17, %v860_v24  ;;  %vm838_vm14 = vcmp.gt.f32.partialorder %v820_v25, 0.0  ;;  %v861_v30 = vmul.f32 %v1506_v35, %v820_v25 }
 0x40d   :  { %892 = vst [vmem:[#allocation10 + $0x70] sm:$0xff] %v876_v29  ;;  %v874_v31 = vsel %vm835_vm13, %v809_v22, %v858_v27  ;;  %vm836_vm15 = vcmp.gt.f32.partialorder %v812_v28, 0.0  ;;  %v859_v32 = vmul.f32 %v1506_v35, %v812_v28 }
 0x40e   :  { %890 = vst [vmem:[#allocation10 + $0x60] sm:$0xff] %v874_v31  ;;  %v877_v34 = vsel %vm838_vm14, %v820_v25, %v861_v30 }
 0x40f   :  { %893 = vst [vmem:[#allocation10 + $0x78] sm:$0xff] %v877_v34  ;;  %v875_v36 = vsel %vm836_vm15, %v812_v28, %v859_v32 }
 0x410   :  { %891 = vst [vmem:[#allocation10 + $0x68] sm:$0xff] %v875_v36 }
 0x411   :  { %1281 = shalt.err (!%p1278_p8)
}
 0x412   :  { %s1282_s16 = scalar_lea.hbm %s1560_s8, 2048 }
 0x413   :  { %p1283_p9 = scmp.ne.s32.totalorder %s1560_s8, %s1282_s16  ;;  %p1286_p10 = scmp.lt.u32.totalorder %s1282_s16, %s1560_s8 }
 0x415   :  { %p1288_p11 = pnand %p1286_p10, %p1283_p9 }
 0x417   :  { %1291 = shalt.err (!%p1288_p11)
}
 0x418   :  { %s1307_s30 = smov 128   ;;  %s1308_s22 = smov 8  }
 0x419   :  { %905 = dma.vmem_to_hbm [thread:$0]  %s900_s7, 2048, %s1560_s8, [#allocation4], %s1307_s30, %s1307_s30, %s1308_s22  }
 0x41a   :  { %1298 = dma.done.wait [#allocation4], 2048  }
 0x41b   :  { %1299 = vsyncadd [#allocation4], 4294965248 }
 0x41c   :  { %909 = vsyncpa [#allocation3], 1 }
 0x41d   :  { %910 = vsyncpa [#allocation6], 1 }
 0x41e   :  { %911 = vsyncpa [#allocation9], 1 }
 0x41f   :  { %912 = vsyncpa [#allocation4], 1 }

</bundles_post_ra>
